<compile_context>
chip_gen: v6e
topology: v6e:2x2x1
jax: 0.10.0
libtpu: 0.0.40
codegen_flags: <defaults>
</compile_context>

<pallas_src>
import math

import jax
import jax.numpy as jnp
from jax.experimental import pallas as pl
from jax.experimental.pallas import tpu as pltpu

SMOOTH = 1e-05
LANE = 128
BASE_ROWS = 8          # f32 sublane height; scaled up for narrower dtypes


def _cdiv(a, b):
    return -(-a // b)


def _round_up(a, b):
    return _cdiv(a, b) * b


def _lane_fold(v):
    """Reduce (R, n*128) -> (R, 128) with only 128-aligned VPU adds.

    Log-depth halving chain; no cross-lane XLU work inside the kernel — the
    single tiny cross-lane reduction happens once in the JAX epilogue.
    """
    tail = None
    w = v.shape[-1]
    while w > LANE:
        half = (w // LANE // 2) * LANE       # floor half, lane aligned
        rem = w - 2 * half                   # 0 or LANE
        if rem:
            last = v[:, 2 * half:]
            tail = last if tail is None else tail + last
        v = v[:, :half] + v[:, half:2 * half]
        w = half
    return v if tail is None else v + tail


def _make_kernel(feat_tile, fr_valid, kh, need_mask, binary_target):
    """Grid = (sample [parallel], feature-half [parallel], tile [arbitrary])."""

    def kernel(x_ref, t_ref, acc_ref):
        h = pl.program_id(1)
        k = pl.program_id(2)

        @pl.when(k == 0)
        def _init():
            acc_ref[...] = jnp.zeros_like(acc_ref)

        x = x_ref[...].astype(jnp.float32)          # stream native dtype in
        t = t_ref[...].astype(jnp.float32)
        # sigmoid via tanh: EUP transcendental, no f32 divide on the VALU.
        s = 0.5 * jnp.tanh(0.5 * x) + 0.5

        if need_mask:
            gk = h * kh + k                          # global feature-tile idx
            col = gk * feat_tile + jax.lax.broadcasted_iota(
                jnp.int32, x.shape, 1)
            valid = col < fr_valid
            # use where (not multiply): OOB reads may be inf/nan garbage.
            s = jnp.where(valid, s, 0.0)
            t = jnp.where(valid, t, 0.0)

        acc_ref[:, 0 * LANE:1 * LANE] += _lane_fold(s * t)   # dice intersect
        acc_ref[:, 1 * LANE:2 * LANE] += _lane_fold(s)       # sum(sigmoid)
        acc_ref[:, 2 * LANE:3 * LANE] += _lane_fold(t)       # sum(target)
        if not binary_target:
            tpos = jnp.where(t > 0.5, 1.0, 0.0)              # IOU intersect
            acc_ref[:, 3 * LANE:4 * LANE] += _lane_fold(tpos)

    return kernel


def _pick_block_bytes():
    """4 MiB/input block + 48 MiB limit (v7x-safe); 8 MiB/80 MiB on big-VMEM chips."""
    block_bytes, vmem_limit = 4 * 1024 * 1024, 48 * 1024 * 1024
    try:
        vmem_cap = pltpu.get_tpu_info().vmem_capacity_bytes
        if vmem_cap >= 100 * 1024 * 1024:            # v5e / v6e: 128 MiB VMEM
            block_bytes, vmem_limit = 8 * 1024 * 1024, 80 * 1024 * 1024
    except Exception:
        pass
    return block_bytes, vmem_limit


def iou_dice_loss(inputs, target, *, binary_target=False, block_bytes=None):
    """Pallas implementation of IOUDiceLoss.forward (returns a scalar).

    binary_target=True asserts target values are {0,1}; the IOU intersection
    then reuses sum(target) and the 4th accumulator/fold is dropped.
    """
    num = target.shape[0]
    feat = math.prod(inputs.shape[1:])

    auto_block, vmem_limit = _pick_block_bytes()
    if block_bytes is None:
        block_bytes = auto_block

    x = inputs.reshape(num, feat)                    # contiguous -> free
    t = target.reshape(num, feat)

    # Rows per sample: fill the full sublane packing of the native dtype.
    min_elt = min(x.dtype.itemsize, t.dtype.itemsize)
    R = BASE_ROWS * max(1, 4 // max(1, min_elt))     # 8 (f32) / 16 (bf16) / 32
    rows = num * R

    pad = (-feat) % R
    if pad:
        # TODO(synk): F % R != 0 still pays one HBM copy so the (B,F)->(B*R,F/R)
        # reshape stays a bitcast; pad values are neutral (sigmoid -> 0, t = 0).
        x = jnp.pad(x, ((0, 0), (0, pad)), constant_values=-1e30)
        t = jnp.pad(t, ((0, 0), (0, pad)), constant_values=0)
    fr = (feat + pad) // R                           # per-row feature length
    xr = x.reshape(rows, fr)                         # free bitcast reshape
    tr = t.reshape(rows, fr)

    # Feature tile: ~block_bytes per input block, sized from real dtypes.
    elt = max(x.dtype.itemsize, t.dtype.itemsize)
    max_cols = max(LANE, (block_bytes // (R * elt)) // LANE * LANE)
    feat_tile = min(_round_up(fr, LANE), max_cols)
    n_k = _cdiv(fr, feat_tile)

    nsplit = 2 if n_k >= 2 else 1                    # feature-parallel halves
    kh = _cdiv(n_k, nsplit)
    need_mask = (nsplit * kh * feat_tile != fr)      # ragged and/or phantom

    n_acc = 3 if binary_target else 4
    acc_w = n_acc * LANE

    if nsplit * kh == n_k:
        def in_map(i, h, k):
            return (i, h * kh + k)
    else:
        # Clamp phantom tiles onto the last real tile; kernel masks them to 0.
        def in_map(i, h, k):
            return (i, jnp.minimum(h * kh + k, n_k - 1))

    in_spec = pl.BlockSpec((R, feat_tile), in_map)
    out_spec = pl.BlockSpec((R, acc_w), lambda i, h, k: (i, h))

    partials = pl.pallas_call(
        _make_kernel(feat_tile, fr, kh, need_mask, binary_target),
        out_shape=jax.ShapeDtypeStruct((rows, nsplit * acc_w), jnp.float32),
        grid_spec=pltpu.PrefetchScalarGridSpec(
            num_scalar_prefetch=0,
            grid=(num, nsplit, kh),
            in_specs=[in_spec, in_spec],
            out_specs=out_spec,
        ),
        compiler_params=pltpu.CompilerParams(
            dimension_semantics=("parallel", "parallel", "arbitrary"),
            vmem_limit_bytes=vmem_limit,
        ),
    )(xr, tr)

    # Tiny O(B) epilogue: fold the lane-dense partials, apply the loss math.
    parts = partials.reshape(num, R, nsplit, n_acc, LANE)
    sums = parts.sum(axis=(1, 2, 4))                 # (num, n_acc)
    inter, s_sum, t_sum = sums[:, 0], sums[:, 1], sums[:, 2]
    dice = (2.0 * inter + SMOOTH) / (s_sum + t_sum + SMOOTH)
    dice_loss = 1.0 - jnp.sum(dice) / num

    # IOULoss branch: sigmoid(sigmoid(x)) > 0.5 for every non-underflowing
    # logit, so intersection == count(target > 0.5) and union == B*F.
    iou_inter = jnp.sum(t_sum) if binary_target else jnp.sum(sums[:, 3])
    union = jnp.float32(num * feat)
    iou_loss = 1.0 - (iou_inter + SMOOTH) / (union + SMOOTH)

    return 0.5 * dice_loss + 0.5 * iou_loss


def iou_dice_loss_ref(inputs, target):
    """Pure-JAX reference mirroring the PyTorch module exactly (incl. quirk)."""
    num = target.shape[0]
    s = jax.nn.sigmoid(inputs.astype(jnp.float32)).reshape(num, -1)
    t = target.astype(jnp.float32).reshape(num, -1)
    inter = (s * t).sum(1)
    dice = (2.0 * inter + SMOOTH) / (s.sum(1) + t.sum(1) + SMOOTH)
    dice_loss = 1.0 - dice.sum() / num
    ss = jax.nn.sigmoid(s)                           # double sigmoid quirk
    in_b = ss > 0.5
    t_b = t > 0.5
    ii = jnp.sum(jnp.logical_and(in_b, t_b).astype(jnp.float32))
    uu = jnp.sum(jnp.logical_or(in_b, t_b).astype(jnp.float32))
    iou_loss = 1.0 - (ii + SMOOTH) / (uu + SMOOTH)
    return 0.5 * dice_loss + 0.5 * iou_loss


if __name__ == "__main__":
    key = jax.random.PRNGKey(0)
    ks = jax.random.split(key, 6)

    # Case 1: F = 1024 (divisible by 8 and 128): copy-free, unmasked path.
    logits = jax.random.normal(ks[0], (2, 4, 16, 16), dtype=jnp.float32)
    target = (jax.random.uniform(ks[1], (2, 4, 16, 16)) > 0.5).astype(jnp.float32)
    ref = iou_dice_loss_ref(logits, target)
    loss = jax.block_until_ready(iou_dice_loss(logits, target))
    assert jnp.allclose(loss, ref, atol=1e-5, rtol=1e-5), (loss, ref)
    loss_b = jax.block_until_ready(iou_dice_loss(logits, target, binary_target=True))
    assert jnp.allclose(loss_b, ref, atol=1e-5, rtol=1e-5), (loss_b, ref)

    # Case 2: F = 300 (not divisible by 8): neutral-pad fallback + in-kernel mask.
    logits2 = jax.random.normal(ks[2], (2, 3, 10, 10), dtype=jnp.float32)
    target2 = (jax.random.uniform(ks[3], (2, 3, 10, 10)) > 0.5).astype(jnp.float32)
    ref2 = iou_dice_loss_ref(logits2, target2)
    loss2 = jax.block_until_ready(iou_dice_loss(logits2, target2))
    assert jnp.allclose(loss2, ref2, atol=1e-5, rtol=1e-5), (loss2, ref2)

    # Case 3: multi-tile + feature-parallel split + ragged AND phantom tiles
    # (forced small tile: fr=1600 -> feat_tile=640, n_k=3, nsplit=2, kh=2).
    logits3 = jax.random.normal(ks[4], (2, 8, 40, 40), dtype=jnp.float32)
    target3 = (jax.random.uniform(ks[5], (2, 8, 40, 40)) > 0.5).astype(jnp.float32)
    ref3 = iou_dice_loss_ref(logits3, target3)
    loss3 = jax.block_until_ready(
        iou_dice_loss(logits3, target3, block_bytes=20 * 1024))
    assert jnp.allclose(loss3, ref3, atol=1e-5, rtol=1e-5), (loss3, ref3)

    print("KERNEL_OK")
</pallas_src>

<mosaic_0001>
module attributes {stable_mosaic.version = 11 : i64} {
  func.func @kernel(%arg0: i32, %arg1: i32, %arg2: i32, %arg3: memref<8x128xf32, #tpu.memory_space<vmem>>, %arg4: memref<8x128xf32, #tpu.memory_space<vmem>>, %arg5: memref<8x512xf32, #tpu.memory_space<vmem>>) attributes {dimension_semantics = [#tpu.dimension_semantics<parallel>, #tpu.dimension_semantics<parallel>, #tpu.dimension_semantics<arbitrary>], iteration_bounds = array<i64: 2, 1, 1>, scalar_prefetch = 0 : i64, scratch_operands = 0 : i64, tpu.core_type = #tpu.core_type<tc>, window_params = [{transform_indices = @transform_0, window_bounds = array<i64: 8, 128>}, {transform_indices = @transform_1, window_bounds = array<i64: 8, 128>}, {transform_indices = @transform_2, window_bounds = array<i64: 8, 512>}]} {
    %c0_i32 = arith.constant 0 : i32
    %0 = arith.cmpi eq, %arg2, %c0_i32 : i32
    %1 = arith.extui %0 : i1 to i32
    %c0_i32_0 = arith.constant 0 : i32
    %2 = arith.cmpi ne, %1, %c0_i32_0 : i32
    scf.if %2 {
      %cst_22 = arith.constant 0.000000e+00 : f32
      %30 = vector.broadcast %cst_22 : f32 to vector<8x512xf32>
      %c0_23 = arith.constant 0 : index
      %c0_24 = arith.constant 0 : index
      %31 = vector.load %arg5[%c0_23, %c0_24] : memref<8x512xf32, #tpu.memory_space<vmem>>, vector<8x512xf32>
      tpu.vector_store %arg5[%c0_23, %c0_24], %30 {strides = array<i32>} : memref<8x512xf32, #tpu.memory_space<vmem>>, vector<8x512xf32>,
    } else {
    }
    %c0 = arith.constant 0 : index
    %c0_1 = arith.constant 0 : index
    %3 = vector.load %arg3[%c0, %c0_1] : memref<8x128xf32, #tpu.memory_space<vmem>>, vector<8x128xf32>
    %c0_2 = arith.constant 0 : index
    %c0_3 = arith.constant 0 : index
    %4 = vector.load %arg4[%c0_2, %c0_3] : memref<8x128xf32, #tpu.memory_space<vmem>>, vector<8x128xf32>
    %cst = arith.constant 5.000000e-01 : f32
    %5 = vector.broadcast %cst : f32 to vector<8x128xf32>
    %6 = arith.mulf %5, %3 : vector<8x128xf32>
    %7 = math.tanh %6 : vector<8x128xf32>
    %cst_4 = arith.constant 5.000000e-01 : f32
    %8 = vector.broadcast %cst_4 : f32 to vector<8x128xf32>
    %9 = arith.mulf %8, %7 : vector<8x128xf32>
    %cst_5 = arith.constant 5.000000e-01 : f32
    %10 = vector.broadcast %cst_5 : f32 to vector<8x128xf32>
    %11 = arith.addf %9, %10 : vector<8x128xf32>
    %c0_6 = arith.constant 0 : index
    %c0_7 = arith.constant 0 : index
    %12 = vector.load %arg5[%c0_6, %c0_7] : memref<8x512xf32, #tpu.memory_space<vmem>>, vector<8x128xf32>
    %13 = arith.mulf %11, %4 : vector<8x128xf32>
    %14 = arith.addf %12, %13 : vector<8x128xf32>
    %c0_8 = arith.constant 0 : index
    %c0_9 = arith.constant 0 : index
    %15 = vector.load %arg5[%c0_8, %c0_9] : memref<8x512xf32, #tpu.memory_space<vmem>>, vector<8x128xf32>
    tpu.vector_store %arg5[%c0_8, %c0_9], %14 {strides = array<i32>} : memref<8x512xf32, #tpu.memory_space<vmem>>, vector<8x128xf32>,
    %c0_10 = arith.constant 0 : index
    %c128 = arith.constant 128 : index
    %16 = vector.load %arg5[%c0_10, %c128] : memref<8x512xf32, #tpu.memory_space<vmem>>, vector<8x128xf32>
    %17 = arith.addf %16, %11 : vector<8x128xf32>
    %c0_11 = arith.constant 0 : index
    %c128_12 = arith.constant 128 : index
    %18 = vector.load %arg5[%c0_11, %c128_12] : memref<8x512xf32, #tpu.memory_space<vmem>>, vector<8x128xf32>
    tpu.vector_store %arg5[%c0_11, %c128_12], %17 {strides = array<i32>} : memref<8x512xf32, #tpu.memory_space<vmem>>, vector<8x128xf32>,
    %c0_13 = arith.constant 0 : index
    %c256 = arith.constant 256 : index
    %19 = vector.load %arg5[%c0_13, %c256] : memref<8x512xf32, #tpu.memory_space<vmem>>, vector<8x128xf32>
    %20 = arith.addf %19, %4 : vector<8x128xf32>
    %c0_14 = arith.constant 0 : index
    %c256_15 = arith.constant 256 : index
    %21 = vector.load %arg5[%c0_14, %c256_15] : memref<8x512xf32, #tpu.memory_space<vmem>>, vector<8x128xf32>
    tpu.vector_store %arg5[%c0_14, %c256_15], %20 {strides = array<i32>} : memref<8x512xf32, #tpu.memory_space<vmem>>, vector<8x128xf32>,
    %cst_16 = arith.constant 5.000000e-01 : f32
    %22 = vector.broadcast %cst_16 : f32 to vector<8x128xf32>
    %23 = arith.cmpf ogt, %4, %22 : vector<8x128xf32>
    %cst_17 = arith.constant 1.000000e+00 : f32
    %cst_18 = arith.constant 0.000000e+00 : f32
    %24 = vector.broadcast %cst_17 : f32 to vector<8x128xf32>
    %25 = vector.broadcast %cst_18 : f32 to vector<8x128xf32>
    %26 = arith.select %23, %24, %25 : vector<8x128xi1>, vector<8x128xf32>
    %c0_19 = arith.constant 0 : index
    %c384 = arith.constant 384 : index
    %27 = vector.load %arg5[%c0_19, %c384] : memref<8x512xf32, #tpu.memory_space<vmem>>, vector<8x128xf32>
    %28 = arith.addf %27, %26 : vector<8x128xf32>
    %c0_20 = arith.constant 0 : index
    %c384_21 = arith.constant 384 : index
    %29 = vector.load %arg5[%c0_20, %c384_21] : memref<8x512xf32, #tpu.memory_space<vmem>>, vector<8x128xf32>
    tpu.vector_store %arg5[%c0_20, %c384_21], %28 {strides = array<i32>} : memref<8x512xf32, #tpu.memory_space<vmem>>, vector<8x128xf32>,
    return
  }
  func.func @transform_0(%arg0: i32, %arg1: i32, %arg2: i32) -> (i32, i32) {
    %c1_i32 = arith.constant 1 : i32
    %0 = arith.muli %arg1, %c1_i32 : i32
    %1 = arith.addi %0, %arg2 : i32
    %c0_i32 = arith.constant 0 : i32
    return %arg0, %1 : i32, i32
  }
  func.func @transform_1(%arg0: i32, %arg1: i32, %arg2: i32) -> (i32, i32) {
    %c1_i32 = arith.constant 1 : i32
    %0 = arith.muli %arg1, %c1_i32 : i32
    %1 = arith.addi %0, %arg2 : i32
    %c0_i32 = arith.constant 0 : i32
    return %arg0, %1 : i32, i32
  }
  func.func @transform_2(%arg0: i32, %arg1: i32, %arg2: i32) -> (i32, i32) {
    %c0_i32 = arith.constant 0 : i32
    return %arg0, %arg1 : i32, i32
  }
}

</mosaic_0001>

<bundles_post_ra>
// kernel: tpu_custom_call.1
= control target key start
LH: loop header
LB: loop body
LE: loop exit
PB: predicated region body
PF: predicated region fallthrough
CT: control target
= control target key end

     0   :  { %7 = vsyncpa [#allocation3], 0  ;;  %s800_s0 = inlined_call_operand.hbm [shape: f32[16,128], index: 0, kind: input, shape index: {}]   ;;  %s801_s1 = inlined_call_operand.hbm [shape: f32[16,128], index: 1, kind: input, shape index: {}]   ;;  %s802_s2 = inlined_call_operand.hbm [shape: f32[16,512], index: 2, kind: output, shape index: {}]  }
   0x1   :  { %9 = vsyncpa [#allocation3 + $0x1], 0 }
   0x2   :  { %10 = vsyncpa [#allocation6], 0 }
   0x3   :  { %12 = vsyncpa [#allocation6 + $0x1], 0 }
   0x4   :  { %13 = vsyncpa [#allocation4], 0 }
   0x5   :  { %15 = vsyncpa [#allocation4 + $0x1], 0  ;;  %s638_s9 = smov 0   ;;  %s640_s10 = smov 0  }
   0x6   :  { %s642_s11 = smov 0   ;;  %s644_s12 = smov 0  }
   0x7   :  { %s646_s13 = smov 0   ;;  %s648_s14 = smov 0  }
   0x8 LB: > { %s389_s15 = sadd.s32 4294967295, %s617_s14   ;;  %s390_s16 = sadd.s32 4294967294, %s617_s14   ;;  %s617_s14 = sphi %s648_s14, %s21_s14   ;;  %s613_s13 = sphi %s646_s13, %s814_s13   ;;  %s609_s12 = sphi %s644_s12, %s813_s12   ;;  %s605_s11 = sphi %s642_s11, %s812_s11   ;;  %s601_s10 = sphi %s640_s10, %s811_s10   ;;  %s597_s9 = sphi %s638_s9, %s810_s9  }
   0x9   : > { %s40_s17 = sadd.s32 1, %s613_s13  ;;  %s51_s18 = sadd.s32 1, %s605_s11 }
   0xa   : > { %p42_p0 = scmp.ge.s32.totalorder %s40_s17, 2  ;;  %p58_p1 = scmp.ne.s32.totalorder %s605_s11, %s601_s10 }
   0xb   : > { %p59_p2 = scmp.eq.s32.totalorder %s617_s14, 0  ;;  %p64_p3 = scmp.ne.s32.totalorder %s601_s10, %s597_s9 }
   0xc   : > { %s816_s17 = smov (%p42_p0, %s40_s17), 0  ;;  %p65_p5 = scmp.eq.s32.totalorder %s389_s15, 0 }
   0xd   : > { %p679_p4 = por %p59_p2, %p58_p1  ;;  %s46_s20 = ssub.s32 %s613_s13, %s816_s17 }
   0xe   : > { %p120_p6 = scmp.eq.s32.totalorder %s389_s15, 1  ;;  %p49_p7 = scmp.eq.s32.totalorder %s46_s20, 0 }
   0xf   : > { %p685_p8 = por %p65_p5, %p64_p3  ;;  %p126_p10 = scmp.eq.s32.totalorder %s390_s16, 1 }
  0x10   : > { %p689_p9 = por %p120_p6, %p58_p1  ;;  %p424_p13 = scmp.lt.s32.totalorder %s617_s14, 2 }
  0x11   : > { %s694_s23 = scalar_select %p49_p7, %s605_s11, %s51_s18  }
  0x12   : > { %p696_p11 = por %p126_p10, %p64_p3  ;;  %s703_s25 = sand.u32 1, %s605_s11  }
  0x13   : > { %s393_s26 = sshll.u32 %s703_s25, 3  ;;  %s394_s27 = sshll.u32 %s613_s13, 7 }
  0x14   : > { %s157_s30 = scalar_lea.hbm %s800_s0, %s394_s27  ;;  %s150_s3 = scalar_lea.vmem [#allocation2], %s393_s26 }
  0x15   : > { %s159_s4 = sshll.u32 %s150_s3, 4  ;;  %p712_p0 = pnand %p424_p13, %p679_p4  ;;  %s160_s4 = int_to_ptr.vmem [resolvable:$true] %s159_s4 }
  0x16   : > { %p397_p1 = scmp.ge.s32.totalorder %s617_s14, 1  ;;  %p184_p2 = scmp.lt.s32.totalorder %s617_s14, 3 }
  0x17   : > { %s147_s6 = scalar_lea.sflag [#allocation3], %s703_s25  ;;  %p479_p3 = pneg %p712_p0 }
  0x18   : > { %s490_s7 = scalar_lea.vmem %s160_s4, 128  ;;  %s619_s8 = smov [#allocation2]  }
  0x19   : > { %p491_p5 = scmp.ne.s32.totalorder %s160_s4, %s490_s7  ;;  %s495_s15 = sshll.u32 %s619_s8, 4  ;;  %s496_s15 = int_to_ptr.vmem [resolvable:$false] %s495_s15 }
  0x1a   : > { %s497_s16 = scalar_lea.vmem %s496_s15, 256  ;;  %p498_p4 = scmp.lt.s32.totalorder %s160_s4, %s496_s15 }
  0x1b   : > { %p493_p6 = pnand %p491_p5, %p479_p3  ;;  %p499_p10 = scmp.lt.s32.totalorder %s497_s16, %s490_s7 }
  0x1d   : > { %p494_p7 = pneg %p493_p6  ;;  %p500_p13 = por %p499_p10, %p498_p4 }
  0x1f   : > { %p501_p12 = pnand %p500_p13, %p494_p7 }
  0x21   : > { %504 = shalt.err (!%p501_p12)
}
  0x22   : > { %416 = dma.hbm_to_vmem [thread:$0]  (!%p712_p0), %s157_s30, 128, %s160_s4, %s147_s6  }
  0x23   : > { %p730_p5 = pnand %p397_p1, %p184_p2  ;;  %s177_s28 = scalar_lea.hbm %s801_s1, %s394_s27 }
  0x24   : > { %s170_s29 = scalar_lea.vmem [#allocation5], %s393_s26  ;;  %s167_s7 = scalar_lea.sflag [#allocation6], %s703_s25 }
  0x25   : > { %s179_s3 = sshll.u32 %s170_s29, 4  ;;  %s620_s30 = smov [#allocation5]   ;;  %s180_s3 = int_to_ptr.vmem [resolvable:$true] %s179_s3 }
  0x26   : > { %s518_s8 = scalar_lea.vmem %s180_s3, 128  ;;  %s523_s4 = sshll.u32 %s620_s30, 4  ;;  %s524_s4 = int_to_ptr.vmem [resolvable:$false] %s523_s4 }
  0x27   : > { %p519_p12 = scmp.ne.s32.totalorder %s180_s3, %s518_s8  ;;  %s525_s6 = scalar_lea.vmem %s524_s4, 256 }
  0x28   : > { %p526_p1 = scmp.lt.s32.totalorder %s180_s3, %s524_s4  ;;  %p527_p2 = scmp.lt.s32.totalorder %s525_s6, %s518_s8 }
  0x29   : > { %p521_p6 = pnand %p519_p12, %p479_p3 }
  0x2a   : > { %p528_p4 = por %p527_p2, %p526_p1 }
  0x2b   : > { %p522_p7 = pneg %p521_p6 }
  0x2d   : > { %p529_p10 = pnand %p528_p4, %p522_p7 }
  0x2f   : > { %532 = shalt.err (!%p529_p10)
}
  0x30   : > { %419 = dma.hbm_to_vmem [thread:$0]  (!%p712_p0), %s177_s28, 128, %s180_s3, %s167_s7  }
  0x31   : > { %188 = sbr.rel (%p730_p5) target bundleno = 93 (0x5d), region = 28  ;;  %s746_s25 = sand.u32 (!%p730_p5), 1, %s601_s10  }
  0x32   : > { %s398_s26 = sshll.u32 (!%p730_p5), %s746_s25, 3  ;;  %s191_s27 = scalar_lea.sflag (!%p730_p5), [#allocation3], %s746_s25 }
  0x33   : > { %s194_s15 = scalar_lea.vmem (!%p730_p5), [#allocation2], %s398_s26 }
  0x36   : > { %584 = dma.done.wait (%p685_p8), %s191_s27, 128  }
  0x37   : > { %586 = vsyncadd (%p685_p8), %s191_s27, 4294967168  ;;  %s200_s5 = scalar_lea.sflag [#allocation6], %s746_s25  ;;  %s203_s16 = scalar_lea.vmem [#allocation5], %s398_s26 }
  0x38   : > { %588 = dma.done.wait (%p685_p8), %s200_s5, 128  }
  0x39   : > { %590 = vsyncadd (%p685_p8), %s200_s5, 4294967168  ;;  %s400_s18 = sshll.u32 %s746_s25, 5  ;;  %v240_v0 = vld [vmem:[%s194_s15] sm:$0xff]  ;;  %v241_v1 = vld [vmem:[%s203_s16] sm:$0xff]  ;;  %v621_v3 = vmov 0.0   ;;  %s406_s21 = sshll.u32 %s609_s12, 9 }
  0x3a   : > { %v242_v2 = vmul.f32 0.5, %v240_v0  ;;  %vm256_vm0 = vcmp.gt.f32.partialorder %v241_v1, 0.5  ;;  %s228_s19 = scalar_lea.vmem [#allocation7], %s400_s18  ;;  %s276_s3 = scalar_lea.hbm %s802_s2, %s406_s21 }
  0x3b   : > { %v257_v4 = vsel %vm256_vm0, 1.0, %v621_v3  ;;  %255 = vst [vmem:[%s228_s19 + $0x10] sm:$0xff] %v241_v1  ;;  %s278_s20 = sshll.u32 %s228_s19, 4  ;;  %s262_s7 = scalar_lea.sflag [#allocation4], %s746_s25  ;;  %s279_s20 = int_to_ptr.vmem [resolvable:$true] %s278_s20 }
  0x3c   : > { %475 = vtanh.f32 %v242_v2  ;;  %260 = vst [vmem:[%s228_s19 + $0x18] sm:$0xff] %v257_v4  ;;  %s533_s8 = scalar_lea.vmem %s279_s20, 512  ;;  %s622_s30 = smov [#allocation7]  }
  0x3d   : > { %p534_p8 = scmp.ne.s32.totalorder %s279_s20, %s533_s8  ;;  %s537_s4 = sshll.u32 %s622_s30, 4  ;;  %s538_s4 = int_to_ptr.vmem [resolvable:$false] %s537_s4 }
  0x3e   : > { %s539_s6 = scalar_lea.vmem %s538_s4, 1024  ;;  %p540_p13 = scmp.lt.s32.totalorder %s279_s20, %s538_s4 }
  0x3f   : > { %p535_p0 = pnand %p534_p8, %p689_p9  ;;  %p541_p5 = scmp.lt.s32.totalorder %s539_s6, %s533_s8 }
  0x41   : > { %p536_p3 = pneg %p535_p0  ;;  %p542_p12 = por %p541_p5, %p540_p13 }
  0x43   : > { %p543_p6 = pnand %p542_p12, %p536_p3 }
  0x49   : > { %v476_v5 = vpop.eup %475 }
  0x4a   : > { %v244_v6 = vmul.f32 0.5, %v476_v5 }
  0x4c   : > { %v245_v7 = vadd.f32 0.5, %v244_v6 }
  0x4e   : > { %v247_v8 = vmul.f32 %v245_v7, %v241_v1  ;;  %252 = vst [vmem:[%s228_s19 + $0x8] sm:$0xff] %v245_v7 }
  0x50   : > { %249 = vst [vmem:[%s228_s19] sm:$0xff] %v247_v8 }
  0x51   : > { %546 = shalt.err (!%p543_p6)
}
  0x52   : > { %s547_s12 = scalar_lea.hbm %s276_s3, 512  ;;  %s551_s27 = scalar_lea.hbm %s802_s2, 1024 }
  0x53   : > { %p548_p7 = scmp.ne.s32.totalorder %s276_s3, %s547_s12  ;;  %p552_p4 = scmp.lt.s32.totalorder %s276_s3, %s802_s2 }
  0x54   : > { %p553_p10 = scmp.lt.s32.totalorder %s551_s27, %s547_s12 }
  0x55   : > { %p549_p1 = pnand %p548_p7, %p689_p9 }
  0x56   : > { %p554_p8 = por %p553_p10, %p552_p4 }
  0x57   : > { %p550_p2 = pneg %p549_p1 }
  0x59   : > { %p555_p0 = pnand %p554_p8, %p550_p2 }
  0x5b   : > { %558 = shalt.err (!%p555_p0)
}
  0x5c   : > { %411 = dma.vmem_to_hbm [thread:$0]  (%p689_p9), %s279_s20, 512, %s276_s3, %s262_s7  }
  0x5d PF: > { %s290_s16 = sand.u32 1, %s597_s9   ;;  %p809_p3 = scmp.ge.s32.totalorder %s617_s14, 2 }
  0x5e   : > { %s291_s18 = scalar_lea.sflag [#allocation4], %s290_s16 }
  0x5f   : > { %p421_p13 = pnand %p809_p3, %p696_p11 }
  0x61   : > { %p422_p5 = pneg %p421_p13 }
  0x63   : > { %592 = dma.done.wait (%p422_p5), %s291_s18, 512  }
  0x64   : > { %594 = vsyncadd (%p422_p5), %s291_s18, 4294966784  ;;  %s21_s14 = sadd.s32 1, %s617_s14   ;;  %s810_s9 = smov %s601_s10 }
  0x65   : > { %p18_p12 = scmp.ge.s32.totalorder %s21_s14, 4   ;;  %s811_s10 = smov %s605_s11 }
  0x66   : > { %s812_s11 = smov %s694_s23  ;;  %s813_s12 = smov %s613_s13 }
  0x67   : > { %s814_s13 = smov %s816_s17  ;;  %20 = sbr.rel (!%p18_p12) target bundleno = 8 (0x8), region = 90 }
  0x6c   :  { %296 = vsyncpa [#allocation3], 1 }
  0x6d   :  { %298 = vsyncpa [#allocation3 + $0x1], 1 }
  0x6e   :  { %299 = vsyncpa [#allocation6], 1 }
  0x6f   :  { %301 = vsyncpa [#allocation6 + $0x1], 1 }
  0x70   :  { %302 = vsyncpa [#allocation4], 1 }
  0x71   :  { %304 = vsyncpa [#allocation4 + $0x1], 1 }

</bundles_post_ra>
